<compile_context>
chip_gen: v7x
topology: tpu7x:2x2x1
jax: 0.10.0
libtpu: 0.0.40
codegen_flags: <defaults>
</compile_context>

<pallas_src>
import functools

import jax
import jax.numpy as jnp
import numpy as np
from jax.experimental import pallas as pl
from jax.experimental.pallas import tpu as pltpu


# ------------------------------ Pallas kernels --------------------------------

def _luts_kernel_smem(w_ref, w2_ref, luts_ref, *, batch, n_ranks):
    """One (B, tile_d) tile of luts = weights @ W2 with weights in SMEM.

    w_ref:    (B, n_ranks) f32 in SMEM (tiny; scalar reads)
    w2_ref:   (n_ranks, tile_d) VMEM  (dominant HBM read, may be bf16)
    luts_ref: (B, tile_d) VMEM        (lane-dense output tile)
    """
    # Load each basis-LUT row once, then n_ranks scalar*vector FMAs per batch
    # row -> pure VALU + vst, hides under the w2/output DMA on every gen.
    w2_rows = [w2_ref[r:r + 1, :].astype(jnp.float32) for r in range(n_ranks)]
    for b in range(batch):
        acc = w_ref[b, 0] * w2_rows[0]
        for r in range(1, n_ranks):
            acc = acc + w_ref[b, r] * w2_rows[r]
        luts_ref[b:b + 1, :] = acc.astype(luts_ref.dtype)


def _luts_kernel_vmem(w_ref, w2_ref, luts_ref):
    """One (tile_b, tile_d) tile of luts = weights @ W2 (larger-B fallback).

    w_ref:    (tile_b, n_ranks) VMEM
    w2_ref:   (n_ranks, tile_d) VMEM
    luts_ref: (tile_b, tile_d)  VMEM
    """
    w = w_ref[...].astype(jnp.float32)
    w2 = w2_ref[...].astype(jnp.float32)
    n_ranks = w.shape[1]
    if n_ranks <= 8:
        # K is tiny: n_ranks VPU broadcast-FMAs instead of an almost-empty
        # K=3 MXU contraction.
        acc = w[:, 0:1] * w2[0:1, :]
        for r in range(1, n_ranks):
            acc = acc + w[:, r:r + 1] * w2[r:r + 1, :]
    else:
        acc = jnp.dot(w, w2, preferred_element_type=jnp.float32)
    luts_ref[...] = acc.astype(luts_ref.dtype)


# ------------------------------ Tile selection ---------------------------------

def _round_up(x, m):
    return (x + m - 1) // m * m


def _pick_tile_d(D, tile_b, w2_itemsize, out_itemsize, n_ranks,
                 min_parallel_blocks=4, vmem_budget_bytes=12 << 20):
    """Largest lane-dense D tile that (a) keeps the double-buffered working set
    under the default scoped VMEM of every TPU generation and (b) leaves at
    least `min_parallel_blocks` blocks along D so v7x's two TensorCores both
    get work."""
    padded_d = _round_up(D, 128)
    # Bytes of VMEM per lane column: double-buffered w2 tile + output tile,
    # plus an f32 accumulator row per batch row.
    bytes_per_col = 2 * (n_ranks * w2_itemsize + tile_b * out_itemsize) + tile_b * 4
    max_cols = max(128, (vmem_budget_bytes // bytes_per_col) // 128 * 128)
    if padded_d <= 512:
        tile_d = padded_d
    else:
        target = _round_up(pl.cdiv(D, min_parallel_blocks), 128)
        tile_d = max(512, target)
    return min(tile_d, max_cols, padded_d)


# ------------------------------ Python wrapper ---------------------------------

def lut_generator_forward(x, w1_t, b1, w2_t, *, n_colors, n_vertices,
                          out_dtype=jnp.float32, tile_d=None, tile_b=128,
                          reshape_luts=True, vmem_limit_bytes=None):
    """LUTGenerator forward.

    Args:
      x:     (B, n_feats) f32
      w1_t:  (n_feats, n_ranks) f32   -- weights_generator.weight.T
      b1:    (n_ranks,)  f32          -- weights_generator.bias
      w2_t:  (n_ranks, D)             -- basis_luts_bank.weight.T
             (pass as bf16 to halve the dominant HBM read; accumulation is f32)
      out_dtype: dtype of luts (f32 default; bf16 halves writeback).
      tile_d / tile_b: lane / sublane tile sizes (auto-picked if tile_d=None).
      reshape_luts: True matches the module's 5-D view.  In production prefer
             False (consume the flat (B, D) buffer / fuse the reshape into the
             downstream LUT-apply index_map): the 5-D view has a 33-wide last
             dim, and the relayout can cost as much HBM traffic as this kernel.
    Returns:
      (weights (B, n_ranks), luts (B, n_colors, V, ..., V)  [or (B, D) flat])
    """
    B, n_feats = x.shape
    n_ranks = w1_t.shape[1]
    D = w2_t.shape[1]
    assert D == n_colors * n_vertices ** n_colors
    assert b1.shape == (n_ranks,)

    # ---- weights = x @ W1 + b1 : a few hundred FLOPs, plain XLA (a dedicated
    # pallas_call adds ~1-3us launch/DMA setup and lane-sparse (B,3) stores).
    weights = jnp.dot(x.astype(jnp.float32), w1_t.astype(jnp.float32),
                      precision=jax.lax.Precision.HIGHEST)
    weights = weights + b1.astype(jnp.float32)[None, :]

    out_itemsize = jnp.dtype(out_dtype).itemsize
    w2_itemsize = jnp.dtype(w2_t.dtype).itemsize

    tile_b = min(tile_b, B)
    if tile_d is None:
        tile_d = _pick_tile_d(D, tile_b, w2_itemsize, out_itemsize, n_ranks)
    tile_d = min(_round_up(tile_d, 128), _round_up(D, 128))

    num_d = pl.cdiv(D, tile_d)
    num_b = pl.cdiv(B, tile_b)

    compiler_kwargs = {}
    if vmem_limit_bytes is not None:
        compiler_kwargs["vmem_limit_bytes"] = vmem_limit_bytes

    # D is streamed exactly once (D is the outer axis in the 2-D grid); the
    # tiny weights tile is re-read once per D block.
    flops = 2 * B * n_ranks * D
    bytes_accessed = (num_d * num_b * tile_b * n_ranks * 4
                      + n_ranks * D * w2_itemsize
                      + B * D * out_itemsize)
    cost = pl.CostEstimate(flops=flops, transcendentals=0,
                           bytes_accessed=bytes_accessed)

    if B <= 8:
        # ---- small-batch path: weights live in SMEM, 1-D grid over D -------
        kernel = functools.partial(_luts_kernel_smem, batch=B, n_ranks=n_ranks)
        luts_flat = pl.pallas_call(
            kernel,
            grid=(num_d,),
            in_specs=[
                pl.BlockSpec(memory_space=pltpu.MemorySpace.SMEM),
                pl.BlockSpec((n_ranks, tile_d), lambda j: (0, j)),
            ],
            out_specs=pl.BlockSpec((B, tile_d), lambda j: (0, j)),
            out_shape=jax.ShapeDtypeStruct((B, D), out_dtype),
            compiler_params=pltpu.CompilerParams(
                dimension_semantics=("parallel",), **compiler_kwargs),
            cost_estimate=cost,
        )(weights, w2_t)
    else:
        # ---- larger-batch path: 2-D grid, D OUTER so the w2 block index is
        # constant across the inner B loop (no re-DMA of the LUT bank). -------
        luts_flat = pl.pallas_call(
            _luts_kernel_vmem,
            grid=(num_d, num_b),
            in_specs=[
                pl.BlockSpec((tile_b, n_ranks), lambda j, i: (i, 0)),
                pl.BlockSpec((n_ranks, tile_d), lambda j, i: (0, j)),
            ],
            out_specs=pl.BlockSpec((tile_b, tile_d), lambda j, i: (i, j)),
            out_shape=jax.ShapeDtypeStruct((B, D), out_dtype),
            compiler_params=pltpu.CompilerParams(
                dimension_semantics=("parallel", "parallel"), **compiler_kwargs),
            cost_estimate=cost,
        )(weights, w2_t)

    if reshape_luts:
        luts = luts_flat.reshape((B, n_colors) + (n_vertices,) * n_colors)
    else:
        luts = luts_flat
    return weights, luts


# ------------------------------ Parameter init ---------------------------------

def init_params(key, n_colors, n_vertices, n_feats, n_ranks):
    """Deterministic parameter init mirroring LUTGenerator.init_weights()."""
    w1 = jax.random.normal(key, (n_ranks, n_feats), dtype=jnp.float32) * 0.1
    b1 = jnp.ones((n_ranks,), dtype=jnp.float32)

    grids = jnp.meshgrid(*[jnp.arange(n_vertices, dtype=jnp.float32)] * n_colors,
                         indexing="ij")
    identity = jnp.stack(grids, axis=0) / (n_vertices - 1)          # (C, V, ..., V)
    identity = jnp.flip(identity, axis=0)
    D = n_colors * n_vertices ** n_colors
    basis = jnp.concatenate(
        [identity.reshape(1, D),
         jnp.zeros((n_ranks - 1, D), dtype=jnp.float32)], axis=0)   # (n_ranks, D)

    w1_t = w1.T          # (n_feats, n_ranks)
    w2_t = basis         # == basis_luts_bank.weight.T, shape (n_ranks, D)
    return w1_t, b1, w2_t


# ----------------------------------- main ---------------------------------------

if __name__ == "__main__":
    def reference(x, w1_t, b1, w2_t):
        xf = np.asarray(x, np.float64)
        w = xf @ np.asarray(w1_t, np.float64) + np.asarray(b1, np.float64)
        luts = w @ np.asarray(w2_t, np.float64)
        return w.astype(np.float32), luts.astype(np.float32)

    key = jax.random.PRNGKey(0)
    kx, kp, kx2, kb = jax.random.split(key, 4)

    # ---- Case 1: small AdaInt-like config, f32, auto-picked tiles ----
    n_colors, n_vertices, n_feats, n_ranks, B = 3, 8, 32, 3, 2
    x = jax.random.normal(kx, (B, n_feats), dtype=jnp.float32)
    w1_t, b1, w2_t = init_params(kp, n_colors, n_vertices, n_feats, n_ranks)

    ref_w, ref_l_flat = reference(x, w1_t, b1, w2_t)
    w_out, l_out = lut_generator_forward(
        x, w1_t, b1, w2_t, n_colors=n_colors, n_vertices=n_vertices)
    jax.block_until_ready((w_out, l_out))
    assert w_out.shape == (B, n_ranks)
    assert l_out.shape == (B, n_colors, n_vertices, n_vertices, n_vertices)
    np.testing.assert_allclose(np.asarray(w_out), ref_w, atol=1e-5, rtol=1e-5)
    np.testing.assert_allclose(np.asarray(l_out).reshape(B, -1), ref_l_flat,
                               atol=1e-5, rtol=1e-5)

    # ---- Case 2: ragged final D tile (D = 3*9^3 = 2187, not a multiple of
    #              tile_d=512) + multi-B-tile VMEM path (B=16 > 8, tile_b=8) ----
    n_vertices2, B2 = 9, 16
    D2 = n_colors * n_vertices2 ** n_colors
    x2 = jax.random.normal(kx2, (B2, n_feats), dtype=jnp.float32)
    w2_rand = jax.random.normal(kb, (n_ranks, D2), dtype=jnp.float32) * 0.05
    ref_w2, ref_l2_flat = reference(x2, w1_t, b1, w2_rand)
    w_out2, l_out2 = lut_generator_forward(
        x2, w1_t, b1, w2_rand, n_colors=n_colors, n_vertices=n_vertices2,
        tile_d=512, tile_b=8)
    jax.block_until_ready((w_out2, l_out2))
    assert l_out2.shape == (B2, n_colors) + (n_vertices2,) * n_colors
    np.testing.assert_allclose(np.asarray(w_out2), ref_w2, atol=1e-5, rtol=1e-5)
    np.testing.assert_allclose(np.asarray(l_out2).reshape(B2, -1), ref_l2_flat,
                               atol=1e-4, rtol=1e-4)

    # ---- Case 3: bf16 LUT bank (halves the dominant HBM read; f32 acc),
    #              flat output (production layout, no relayout) ----
    w2_bf16 = w2_t.astype(jnp.bfloat16)
    w_out3, l_out3 = lut_generator_forward(
        x, w1_t, b1, w2_bf16, n_colors=n_colors, n_vertices=n_vertices,
        reshape_luts=False)
    jax.block_until_ready((w_out3, l_out3))
    assert l_out3.shape == (B, n_colors * n_vertices ** n_colors)
    np.testing.assert_allclose(np.asarray(w_out3), ref_w, atol=1e-5, rtol=1e-5)
    np.testing.assert_allclose(np.asarray(l_out3), ref_l_flat,
                               atol=3e-2, rtol=3e-2)

    print("KERNEL_OK")
</pallas_src>

<mosaic_0001>
module attributes {stable_mosaic.version = 11 : i64} {
  func.func @_luts_kernel_smem(%arg0: i32, %arg1: memref<2x3xf32, #tpu.memory_space<smem>>, %arg2: memref<3x512xf32, #tpu.memory_space<vmem>>, %arg3: memref<2x512xf32, #tpu.memory_space<vmem>>) attributes {dimension_semantics = [#tpu.dimension_semantics<parallel>], iteration_bounds = array<i64: 3>, scalar_prefetch = 0 : i64, scratch_operands = 0 : i64, tpu.core_type = #tpu.core_type<tc>, window_params = [{transform_indices = @transform_0, window_bounds = array<i64: 2, 3>}, {transform_indices = @transform_1, window_bounds = array<i64: 3, 512>}, {transform_indices = @transform_2, window_bounds = array<i64: 2, 512>}]} {
    %c0 = arith.constant 0 : index
    %c0_0 = arith.constant 0 : index
    %0 = vector.load %arg2[%c0, %c0_0] : memref<3x512xf32, #tpu.memory_space<vmem>>, vector<1x512xf32>
    %c1 = arith.constant 1 : index
    %c0_1 = arith.constant 0 : index
    %1 = vector.load %arg2[%c1, %c0_1] : memref<3x512xf32, #tpu.memory_space<vmem>>, vector<1x512xf32>
    %c2 = arith.constant 2 : index
    %c0_2 = arith.constant 0 : index
    %2 = vector.load %arg2[%c2, %c0_2] : memref<3x512xf32, #tpu.memory_space<vmem>>, vector<1x512xf32>
    %c0_3 = arith.constant 0 : index
    %c0_4 = arith.constant 0 : index
    %3 = memref.load %arg1[%c0_3, %c0_4] : memref<2x3xf32, #tpu.memory_space<smem>>
    %4 = vector.broadcast %3 : f32 to vector<1x512xf32>
    %5 = arith.mulf %4, %0 : vector<1x512xf32>
    %c0_5 = arith.constant 0 : index
    %c1_6 = arith.constant 1 : index
    %6 = memref.load %arg1[%c0_5, %c1_6] : memref<2x3xf32, #tpu.memory_space<smem>>
    %7 = vector.broadcast %6 : f32 to vector<1x512xf32>
    %8 = arith.mulf %7, %1 : vector<1x512xf32>
    %9 = arith.addf %5, %8 : vector<1x512xf32>
    %c0_7 = arith.constant 0 : index
    %c2_8 = arith.constant 2 : index
    %10 = memref.load %arg1[%c0_7, %c2_8] : memref<2x3xf32, #tpu.memory_space<smem>>
    %11 = vector.broadcast %10 : f32 to vector<1x512xf32>
    %12 = arith.mulf %11, %2 : vector<1x512xf32>
    %13 = arith.addf %9, %12 : vector<1x512xf32>
    %c0_9 = arith.constant 0 : index
    %c0_10 = arith.constant 0 : index
    %14 = vector.load %arg3[%c0_9, %c0_10] : memref<2x512xf32, #tpu.memory_space<vmem>>, vector<1x512xf32>
    tpu.vector_store %arg3[%c0_9, %c0_10], %13 {strides = array<i32>} : memref<2x512xf32, #tpu.memory_space<vmem>>, vector<1x512xf32>,
    %c1_11 = arith.constant 1 : index
    %c0_12 = arith.constant 0 : index
    %15 = memref.load %arg1[%c1_11, %c0_12] : memref<2x3xf32, #tpu.memory_space<smem>>
    %16 = vector.broadcast %15 : f32 to vector<1x512xf32>
    %17 = arith.mulf %16, %0 : vector<1x512xf32>
    %c1_13 = arith.constant 1 : index
    %c1_14 = arith.constant 1 : index
    %18 = memref.load %arg1[%c1_13, %c1_14] : memref<2x3xf32, #tpu.memory_space<smem>>
    %19 = vector.broadcast %18 : f32 to vector<1x512xf32>
    %20 = arith.mulf %19, %1 : vector<1x512xf32>
    %21 = arith.addf %17, %20 : vector<1x512xf32>
    %c1_15 = arith.constant 1 : index
    %c2_16 = arith.constant 2 : index
    %22 = memref.load %arg1[%c1_15, %c2_16] : memref<2x3xf32, #tpu.memory_space<smem>>
    %23 = vector.broadcast %22 : f32 to vector<1x512xf32>
    %24 = arith.mulf %23, %2 : vector<1x512xf32>
    %25 = arith.addf %21, %24 : vector<1x512xf32>
    %c1_17 = arith.constant 1 : index
    %c0_18 = arith.constant 0 : index
    %26 = vector.load %arg3[%c1_17, %c0_18] : memref<2x512xf32, #tpu.memory_space<vmem>>, vector<1x512xf32>
    tpu.vector_store %arg3[%c1_17, %c0_18], %25 {strides = array<i32>} : memref<2x512xf32, #tpu.memory_space<vmem>>, vector<1x512xf32>,
    return
  }
  func.func @transform_0(%arg0: i32) -> (i32, i32) {
    %c0_i32 = arith.constant 0 : i32
    %c0_i32_0 = arith.constant 0 : i32
    %c0_i32_1 = arith.constant 0 : i32
    return %c0_i32, %c0_i32_0 : i32, i32
  }
  func.func @transform_1(%arg0: i32) -> (i32, i32) {
    %c0_i32 = arith.constant 0 : i32
    %c0_i32_0 = arith.constant 0 : i32
    return %c0_i32, %arg0 : i32, i32
  }
  func.func @transform_2(%arg0: i32) -> (i32, i32) {
    %c0_i32 = arith.constant 0 : i32
    %c0_i32_0 = arith.constant 0 : i32
    return %c0_i32, %arg0 : i32, i32
  }
}

</mosaic_0001>

<bundles_post_ra>
// kernel: tpu_custom_call.1
= control target key start
LH: loop header
LB: loop body
LE: loop exit
PB: predicated region body
PF: predicated region fallthrough
CT: control target
= control target key end

     0   :  { %7 = vsyncpa [#allocation5], 0  ;;  %s725_s0 = inlined_call_operand.hbm [shape: f32[2,3], index: 0, kind: input, shape index: {}]   ;;  %s726_s1 = inlined_call_operand.hbm [shape: f32[3,1536], index: 1, kind: input, shape index: {}]   ;;  %s727_s2 = inlined_call_operand.hbm [shape: f32[2,1536], index: 2, kind: output, shape index: {}]  }
   0x1   :  { %8 = vsyncpa [#allocation3], 0 }
   0x2   :  { %10 = vsyncpa [#allocation3 + $0x1], 0 }
   0x3   :  { %11 = vsyncpa [#allocation4], 0 }
   0x4   :  { %13 = vsyncpa [#allocation4 + $0x1], 0  ;;  %s521_s9 = smov 0   ;;  %s523_s10 = smov 0  }
   0x5   :  { %s525_s11 = smov 0   ;;  %s527_s12 = smov 0  }
   0x6 LB: > { %s542_s13 = sadd.s32 4294967295, %s501_s12   ;;  %s305_s14 = sadd.s32 4294967294, %s501_s12   ;;  %s501_s12 = sphi %s527_s12, %s747_s12   ;;  %s497_s11 = sphi %s525_s11, %s746_s11   ;;  %s493_s10 = sphi %s523_s10, %s745_s10   ;;  %s489_s9 = sphi %s521_s9, %s744_s9  }
   0x7   : > { %p60_p0 = scmp.ne.s32.totalorder %s493_s10, %s489_s9  ;;  %p728_p1 = scmp.eq.s32.totalorder %s542_s13, 0 }
   0x8   : > { %p90_p3 = scmp.eq.s32.totalorder %s305_s14, 2  ;;  %p306_p5 = scmp.ge.s32.totalorder %s501_s12, 1 }
   0x9   : > { %p551_p4 = por %p728_p1, %p60_p0  ;;  %p97_p7 = scmp.lt.s32.totalorder %s501_s12, 4 }
   0xa   : > { %p556_p6 = por %p90_p3, %p60_p0  ;;  %s566_s18 = sadd.s32 1, %s501_s12  }
   0xb   : > { %s731_s15 = scalar_select %p551_p4, 1, 0 }
   0xc   : > { %s732_s16 = scalar_select %p556_p6, 1, 0 }
   0xd   : > { %p561_p8 = pnand %p306_p5, %p97_p7  ;;  %s44_s19 = ssub.s32 %s501_s12, %s566_s18 }
   0xe   : > { %s47_s20 = sadd.s32 1, %s497_s11  ;;  %p579_p11 = scmp.eq.s32.totalorder %s44_s19, 0 }
   0xf   : > { %p339_p9 = pneg %p561_p8  ;;  %p54_p12 = scmp.ne.s32.totalorder %s497_s11, %s493_s10 }
  0x10   : > { %p55_p13 = scmp.eq.s32.totalorder %s501_s12, 0  ;;  %p352_p0 = scmp.lt.s32.totalorder %s501_s12, 3 }
  0x11   : > { %p575_p10 = pnand %p339_p9, %p728_p1  ;;  %s388_s25 = scalar_lea.hbm %s725_s0, 32 }
  0x12   : > { %p389_p3 = scmp.ne.s32.totalorder %s725_s0, %s388_s25  ;;  %p395_p1 = scmp.lt.u32.totalorder %s388_s25, %s725_s0 }
  0x13   : > { %p390_p5 = pneg %p575_p10 }
  0x15   : > { %p391_p7 = pnand %p390_p5, %p389_p3 }
  0x17   : > { %p392_p9 = pneg %p391_p7 }
  0x19   : > { %p397_p2 = pnand %p395_p1, %p392_p9 }
  0x1b   : > { %400 = shalt.err (!%p397_p2)
}
  0x1c   : > { %s503_s30 = smov [#allocation2]   ;;  %p56_p1 = por %p55_p13, %p54_p12 }
  0x1d   : > { %342 = dma.hbm_to_smem (!%p575_p10), %s725_s0, 32, %s503_s30, [#allocation5]  }
  0x1e   : > { %s606_s5 = scalar_select %p579_p11, %s497_s11, %s47_s20  }
  0x1f   : > { %p736_p2 = scmp.eq.s32.totalorder %s542_s13, 2  ;;  %s119_s7 = sand.u32 1, %s497_s11  }
  0x20   : > { %s329_s8 = sshll.u32 %s501_s12, 8  ;;  %s309_s14 = sshll.u32 %s119_s7, 4 }
  0x21   : > { %p618_p3 = por %p736_p2, %p54_p12  ;;  %s627_s23 = scalar_lea.hbm %s726_s1, %s329_s8 }
  0x22   : > { %s123_s20 = scalar_lea.vmem [#allocation6], %s309_s14  ;;  %p631_p10 = pnand %p352_p0, %p56_p1 }
  0x23   : > { %s737_s6 = scalar_select %p618_p3, 1, 0 }
  0x24   : > { %s131_s22 = sshll.u32 %s123_s20, 4  ;;  %s120_s25 = scalar_lea.sflag [#allocation3], %s119_s7  ;;  %s635_s22 = int_to_ptr.vmem [resolvable:$true] %s131_s22 }
  0x25   : > { %s401_s26 = scalar_lea.hbm %s627_s23, 256  ;;  %p403_p12 = pneg %p631_p10 }
  0x26   : > { %p402_p11 = scmp.ne.s32.totalorder %s627_s23, %s401_s26  ;;  %s406_s29 = scalar_lea.hbm %s726_s1, 768 }
  0x27   : > { %p407_p0 = scmp.lt.u32.totalorder %s627_s23, %s726_s1  ;;  %p408_p7 = scmp.lt.u32.totalorder %s406_s29, %s401_s26 }
  0x28   : > { %p404_p13 = pnand %p403_p12, %p402_p11  ;;  %p410_p1 = scmp.lt.u32.totalorder %s401_s26, %s627_s23 }
  0x29   : > { %p409_p9 = por %p408_p7, %p407_p0 }
  0x2a   : > { %p405_p5 = pneg %p404_p13 }
  0x2b   : > { %p411_p2 = por %p410_p1, %p409_p9 }
  0x2d   : > { %p412_p6 = pnand %p411_p2, %p405_p5 }
  0x2f   : > { %415 = shalt.err (!%p412_p6)
}
  0x30   : > { %s416_s4 = scalar_lea.vmem %s635_s22, 256  ;;  %s504_s7 = smov [#allocation6]  }
  0x31   : > { %p417_p11 = scmp.ne.s32.totalorder %s635_s22, %s416_s4  ;;  %s421_s8 = sshll.u32 %s504_s7, 4  ;;  %s422_s8 = int_to_ptr.vmem [resolvable:$false] %s421_s8 }
  0x32   : > { %s423_s14 = scalar_lea.vmem %s422_s8, 512  ;;  %p424_p4 = scmp.lt.s32.totalorder %s635_s22, %s422_s8 }
  0x33   : > { %p419_p13 = pnand %p417_p11, %p403_p12  ;;  %p425_p0 = scmp.lt.s32.totalorder %s423_s14, %s416_s4 }
  0x35   : > { %p420_p3 = pneg %p419_p13  ;;  %p426_p7 = por %p425_p0, %p424_p4 }
  0x37   : > { %p427_p9 = pnand %p426_p7, %p420_p3 }
  0x39   : > { %430 = shalt.err (!%p427_p9)
}
  0x3a   : > { %346 = dma.hbm_to_vmem [thread:$0]  (!%p631_p10), %s627_s23, 256, %s635_s22, %s120_s25  }
  0x3b   : > { %140 = sbr.rel (%p561_p8) target bundleno = 102 (0x66), region = 28  ;;  %p739_p6 = scmp.eq.s32.totalorder (!%p561_p8), %s542_s13, 0 }
  0x42   : > { %476 = dma.done.wait (%p739_p6), [#allocation5], 32   ;;  %p740_p12 = pmov %p739_p6 }
  0x43   : > { %s669_s19 = sand.u32 1, %s493_s10   ;;  %p741_p4 = scmp.ne.s32.totalorder %s731_s15, 0 }
  0x44   : > { %478 = vsyncadd (%p740_p12), [#allocation5], 4294967264  ;;  %s314_s21 = sshll.u32 %s669_s19, 4  ;;  %s147_s20 = scalar_lea.sflag [#allocation3], %s669_s19 }
  0x45   : > { %s150_s24 = scalar_lea.vmem [#allocation6], %s314_s21 }
  0x46   : > { %480 = dma.done.wait (%p741_p4), %s147_s20, 256  }
  0x47   : > { %482 = vsyncadd (%p741_p4), %s147_s20, 4294967040 }
  0x48   : > { %155 = sfence }
  0x49   : > { %s179_s17 = sld [smem:[#allocation2]]  ;;  %s318_s23 = sld [smem:[#allocation2 + $0x1]]  ;;  %v174_v0 = vld [vmem:[%s150_s24] ss:$4 sm:$0xf]  ;;  %v190_v6 = vlaneseq }
  0x4a   : > { %s319_s22 = sld [smem:[#allocation2 + $0x2]]  ;;  %s320_s25 = sld [smem:[#allocation2 + $0x80]]  ;;  %v316_v1 = vld [vmem:[%s150_s24 + $0x1] ss:$4 sm:$0xf] }
  0x4b   : > { %s321_s26 = sld [smem:[#allocation2 + $0x81]]  ;;  %s315_s27 = sshll.u32 %s669_s19, 3  ;;  %v317_v2 = vld [vmem:[%s150_s24 + $0x2] ss:$4 sm:$0xf]  ;;  %vm192_vm0 = vcmp.lt.s32.totalorder %v190_v6, 512 }
  0x4c   : > { %s322_s28 = sld [smem:[#allocation2 + $0x82]]  ;;  %s171_s15 = scalar_lea.vmem [#allocation7], %s315_s27 }
  0x4d   : > { %s223_s29 = sshll.u32 %s171_s15, 4  ;;  %s330_s30 = sshll.u32 %s542_s13, 7  ;;  %s679_s29 = int_to_ptr.vmem [resolvable:$true] %s223_s29 }
  0x4e   : > { %s684_s7 = scalar_lea.hbm %s727_s2, %s330_s30  ;;  %s209_s8 = scalar_lea.sflag [#allocation4], %s669_s19 }
  0x4f   : > { %v180_v3 = vstv %s179_s17  ;;  %v183_v5 = vstv %s318_s23  ;;  %s431_s14 = scalar_lea.vmem %s679_s29, 128  ;;  %p742_p3 = scmp.ne.s32.totalorder %s737_s6, 0 }
  0x50   : > { %v181_v4 = vmul.f32 %v180_v3, %v174_v0  ;;  %v184_v7 = vmul.f32 %v316_v1, %v183_v5  ;;  %v187_v8 = vstv %s319_s22  ;;  %v196_v10 = vstv %s320_s25  ;;  %p432_p8 = scmp.ne.s32.totalorder %s679_s29, %s431_s14  ;;  %s505_s13 = smov [#allocation7]  }
  0x51   : > { %v188_v9 = vmul.f32 %v317_v2, %v187_v8  ;;  %v197_v12 = vmul.f32 %v196_v10, %v174_v0  ;;  %v199_v13 = vstv %s321_s26  ;;  %s435_s21 = sshll.u32 %s505_s13, 4  ;;  %s436_s21 = int_to_ptr.vmem [resolvable:$false] %s435_s21 }
  0x52   : > { %v185_v11 = vadd.f32 %v184_v7, %v181_v4  ;;  %v200_v14 = vmul.f32 %v316_v1, %v199_v13  ;;  %v203_v15 = vstv %s322_s28  ;;  %p433_p10 = pnand %p432_p8, %p742_p3  ;;  %s437_s20 = scalar_lea.vmem %s436_s21, 256 }
  0x53   : > { %v204_v17 = vmul.f32 %v317_v2, %v203_v15  ;;  %p438_p1 = scmp.lt.s32.totalorder %s679_s29, %s436_s21  ;;  %p439_p2 = scmp.lt.s32.totalorder %s437_s20, %s431_s14 }
  0x54   : > { %v189_v16 = vadd.f32 %v188_v9, %v185_v11  ;;  %v201_v18 = vadd.f32 %v200_v14, %v197_v12  ;;  %p434_p5 = pneg %p433_p10 }
  0x55   : > { %p440_p11 = por %p439_p2, %p438_p1 }
  0x56   : > { %194 = vst.msk [vmem:[%s171_s15] ss:$2 sm:$0xf] %vm192_vm0, %v189_v16  ;;  %v205_v19 = vadd.f32 %v204_v17, %v201_v18 }
  0x57   : > { %p441_p13 = pnand %p440_p11, %p434_p5 }
  0x58   : > { %323 = vst.msk [vmem:[%s171_s15 + $0x1] ss:$2 sm:$0xf] %vm192_vm0, %v205_v19 }
  0x59   : > { %444 = shalt.err (!%p441_p13)
}
  0x5a   : > { %s445_s19 = scalar_lea.hbm %s684_s7, 128  ;;  %s449_s23 = scalar_lea.hbm %s727_s2, 384 }
  0x5b   : > { %p446_p0 = scmp.ne.s32.totalorder %s684_s7, %s445_s19  ;;  %p450_p6 = scmp.lt.u32.totalorder %s684_s7, %s727_s2 }
  0x5c   : > { %p451_p12 = scmp.lt.u32.totalorder %s449_s23, %s445_s19  ;;  %p453_p8 = scmp.lt.u32.totalorder %s445_s19, %s684_s7 }
  0x5d   : > { %p447_p7 = pnand %p446_p0, %p742_p3 }
  0x5e   : > { %p452_p4 = por %p451_p12, %p450_p6 }
  0x5f   : > { %p448_p9 = pneg %p447_p7 }
  0x60   : > { %p454_p10 = por %p453_p8, %p452_p4 }
  0x62   : > { %p455_p5 = pnand %p454_p10, %p448_p9 }
  0x64   : > { %458 = shalt.err (!%p455_p5)
}
  0x65   : > { %337 = dma.vmem_to_hbm [thread:$0]  (%p742_p3), %s679_s29, 128, %s684_s7, %s209_s8  }
  0x66 PF: > { %p354_p1 = scmp.ge.s32.totalorder %s501_s12, 2  ;;  %s235_s26 = sand.u32 1, %s489_s9  }
  0x67   : > { %p743_p2 = scmp.ne.s32.totalorder %s732_s16, 0  ;;  %s236_s27 = scalar_lea.sflag [#allocation4], %s235_s26 }
  0x69   : > { %p348_p11 = pnand %p354_p1, %p743_p2 }
  0x6b   : > { %484 = dma.done.wait (!%p348_p11), %s236_s27, 128  }
  0x6c   : > { %486 = vsyncadd (!%p348_p11), %s236_s27, 4294967168  ;;  %p16_p13 = scmp.ge.s32.totalorder %s566_s18, 5   ;;  %s744_s9 = smov %s493_s10 }
  0x6d   : > { %s745_s10 = smov %s497_s11  ;;  %s746_s11 = smov %s606_s5 }
  0x6e   : > { %s747_s12 = smov %s566_s18  ;;  %18 = sbr.rel (!%p16_p13) target bundleno = 6 (0x6), region = 81 }
  0x75   :  { %241 = vsyncpa [#allocation3], 1 }
  0x76   :  { %243 = vsyncpa [#allocation3 + $0x1], 1 }
  0x77   :  { %244 = vsyncpa [#allocation4], 1 }
  0x78   :  { %246 = vsyncpa [#allocation4 + $0x1], 1 }
  0x79   :  { %247 = vsyncpa [#allocation5], 1 }
  0x7a   :  { %249 = vsyncpa [#allocation5 + $0x1], 1 }

</bundles_post_ra>
